<compile_context>
chip_gen: v5e
topology: v5e:2x2
jax: 0.10.0
libtpu: 0.0.40
codegen_flags: <defaults>
</compile_context>

<pallas_src>
import functools
import math

import jax
import jax.numpy as jnp
from jax.experimental import pallas as pl
from jax.experimental.pallas import tpu as pltpu


_LANE = 128      # minimum lane padding of every feature axis
_SUBLANE = 8     # sublane granularity for the batch (second-to-last) dim
_LN_EPS = 1e-5   # torch.nn.LayerNorm default eps


def _round_up(x, m):
    return ((x + m - 1) // m) * m


def _cdiv(a, b):
    return -(-a // b)


def _tpu_generation_info():
    """Returns (vmem_capacity_bytes, tensorcores_per_chip, mxu_lane_width).

    Conservative fallbacks (64 MiB / 1 core / 128 lanes) if introspection fails,
    so the kernel stays safe on any generation."""
    vmem = 64 << 20
    cores = 1
    mxu = 128
    try:
        info = pltpu.get_tpu_info()
        vmem = int(getattr(info, "vmem_capacity_bytes", vmem))
    except Exception:
        pass
    try:
        kind = jax.devices()[0].device_kind.lower()
        if "v7" in kind:
            cores = 2          # 2 TensorCores per chip on v7x
        if "v6" in kind or "v7" in kind:
            mxu = 256          # 2x256x256 MXU
        if "v5" in kind or "v6" in kind:
            vmem = max(vmem, 128 << 20)
    except Exception:
        pass
    return vmem, cores, mxu


def _mlp_kernel(x_ref, *refs, true_widths, padded_widths, mxu_dtype):
    """Fully-fused MLP: L x [Linear -> ReLU -> LayerNorm] on one batch tile.

    refs = (w0, bgb0, w1, bgb1, ..., o_ref), where bgb_l stacks
    [bias; gamma; beta] as a (3, Dpad) array.  All feature dims are zero-padded;
    padded lanes of W / bias / gamma / beta are zero, so padded activation lanes
    remain exactly zero across layers."""
    o_ref = refs[-1]
    layer_refs = refs[:-1]

    h = x_ref[...]                                    # (TB, Dpad) in mxu_dtype (layer 0)
    for l, d_true in enumerate(true_widths):          # static unroll (L is tiny)
        w_ref = layer_refs[2 * l]
        bgb = layer_refs[2 * l + 1][...]              # (3, Dpad): bias / gamma / beta

        # Linear on the MXU (bf16 inputs, f32 accumulation) + bias + ReLU.
        y = jnp.dot(h.astype(mxu_dtype), w_ref[...],
                    preferred_element_type=jnp.float32)
        y = jnp.maximum(y + bgb[0:1, :], 0.0)

        # LayerNorm over the true feature width: two-pass (centered) variance
        # to avoid the s2/D - mean^2 cancellation that post-ReLU rows provoke.
        d_pad = padded_widths[l]
        inv_d = jnp.float32(1.0 / d_true)
        mean = jnp.sum(y, axis=-1, keepdims=True) * inv_d
        centered = y - mean
        if d_pad != d_true:
            lane = jax.lax.broadcasted_iota(jnp.int32, (1, d_pad), 1)
            centered = jnp.where(lane < d_true, centered, 0.0)
        var = jnp.sum(centered * centered, axis=-1, keepdims=True) * inv_d

        # gamma/beta are zero in padded lanes -> next layer's input invariant holds.
        h = centered * jax.lax.rsqrt(var + _LN_EPS) * bgb[1:2, :] + bgb[2:3, :]

    o_ref[...] = h.astype(o_ref.dtype)


def init_mlp_params(key, input_size, sizes):
    """Torch-default init: Linear ~ U(-1/sqrt(fan_in), +), LayerNorm ones/zeros."""
    dims = [input_size] + list(sizes)
    params = []
    for i in range(len(dims) - 1):
        d_in, d_out = dims[i], dims[i + 1]
        key, kw, kb = jax.random.split(key, 3)
        bound = 1.0 / math.sqrt(d_in)
        w = jax.random.uniform(kw, (d_out, d_in), jnp.float32, -bound, bound)
        b = jax.random.uniform(kb, (d_out,), jnp.float32, -bound, bound)
        gamma = jnp.ones((d_out,), jnp.float32)
        beta = jnp.zeros((d_out,), jnp.float32)
        params.append((w, b, gamma, beta))
    return params


def prepare_params(params, mxu_dtype=jnp.bfloat16, lane_multiple=None):
    """One-time packing: W transposed to (Din, Dout), zero-padded, cast to the
    MXU input dtype; bias/gamma/beta stacked into one zero-padded (3, Dpad)."""
    if lane_multiple is None:
        _, _, lane_multiple = _tpu_generation_info()

    def pad_dim(d):
        gran = 256 if (lane_multiple >= 256 and d >= 256) else _LANE
        return _round_up(d, gran)

    prepped = []
    for (w, b, g, beta) in params:
        d_out, d_in = w.shape
        dip, dop = pad_dim(d_in), pad_dim(d_out)
        w_t = jnp.zeros((dip, dop), jnp.float32).at[:d_in, :d_out].set(w.T)
        bgb = (jnp.zeros((3, dop), jnp.float32)
               .at[0, :d_out].set(b)
               .at[1, :d_out].set(g)
               .at[2, :d_out].set(beta))
        prepped.append((w_t.astype(mxu_dtype), bgb))
    return tuple(prepped)


def _pick_batch_tile(batch, vmem_cap, num_cores):
    """Batch tile: large on 128 MiB chips, capped on v7x, >= num_cores grid
    steps when the batch allows, and minimal batch padding."""
    b_al = _round_up(batch, _SUBLANE)
    max_tb = 512 if vmem_cap >= (128 << 20) else 256
    tb = min(max_tb, b_al)
    if num_cores > 1 and b_al >= num_cores * _SUBLANE and _cdiv(b_al, tb) < num_cores:
        tb = _round_up(_cdiv(b_al, num_cores), _SUBLANE)

    best, best_waste = tb, _round_up(b_al, tb) - batch
    for cand in (512, 256, 128, 64, 32, 16, 8):
        if cand > max_tb or cand > b_al:
            continue
        if num_cores > 1 and b_al >= num_cores * _SUBLANE and _cdiv(b_al, cand) < num_cores:
            continue
        waste = _round_up(b_al, cand) - batch
        if waste < best_waste or (waste == best_waste and cand > best):
            best, best_waste = cand, waste
    return best


@functools.partial(jax.jit,
                   static_argnames=("widths", "tb", "vmem_limit", "param_buffers"))
def _mlp_forward_impl(x, prepped, widths, tb, vmem_limit, param_buffers):
    batch, d_in = x.shape
    d_in_pad = prepped[0][0].shape[0]
    d_out_pad = prepped[-1][0].shape[1]
    mxu_dtype = prepped[0][0].dtype
    padded_widths = tuple(w.shape[1] for (w, _) in prepped)

    b_pad = _round_up(batch, tb)

    # Activations enter the kernel in the MXU dtype: half the DMA bytes of f32.
    x_cast = x.astype(mxu_dtype)
    if b_pad != batch or d_in_pad != d_in:
        x_kern = jnp.zeros((b_pad, d_in_pad), mxu_dtype).at[:batch, :d_in].set(x_cast)
    else:
        x_kern = x_cast

    def const_spec(shape):
        # Constant index_map -> no need for a 2-deep pipeline buffer.
        if param_buffers == 1:
            return pl.BlockSpec(shape, lambda i: (0, 0), pipeline_mode=pl.Buffered(1))
        return pl.BlockSpec(shape, lambda i: (0, 0))

    in_specs = [pl.BlockSpec((tb, d_in_pad), lambda i: (i, 0))]
    flat = []
    for (w, bgb) in prepped:
        in_specs.append(const_spec(w.shape))
        in_specs.append(const_spec(bgb.shape))
        flat += [w, bgb]
    out_specs = pl.BlockSpec((tb, d_out_pad), lambda i: (i, 0))

    kernel = functools.partial(_mlp_kernel, true_widths=widths,
                               padded_widths=padded_widths, mxu_dtype=mxu_dtype)

    out_pad = pl.pallas_call(
        kernel,
        out_shape=jax.ShapeDtypeStruct((b_pad, d_out_pad), jnp.float32),
        grid=(b_pad // tb,),
        in_specs=in_specs,
        out_specs=out_specs,
        compiler_params=pltpu.CompilerParams(
            dimension_semantics=("parallel",),
            vmem_limit_bytes=vmem_limit),
    )(x_kern, *flat)

    if b_pad != batch or d_out_pad != widths[-1]:
        out_pad = out_pad[:batch, :widths[-1]]
    return out_pad


def mlp_forward(x, prepped, widths):
    """x: (batch, input_size) f32.  prepped: output of prepare_params.
    widths: tuple of true layer output widths (== sizes)."""
    widths = tuple(int(w) for w in widths)
    batch, d_in = x.shape

    # Guard against raw / unpadded params (padded-lane invariant depends on it).
    d_in_pad = prepped[0][0].shape[0]
    assert d_in <= d_in_pad, "input width exceeds prepared padded width"
    prev = d_in_pad
    for (w, bgb), d_out in zip(prepped, widths):
        assert w.shape[0] == prev, "params must come from prepare_params (layer chain mismatch)"
        assert bgb.shape == (3, w.shape[1]) and d_out <= w.shape[1], "bad packed bias/gamma/beta"
        prev = w.shape[1]

    vmem_cap, num_cores, _ = _tpu_generation_info()
    tb = _pick_batch_tile(batch, vmem_cap, num_cores)

    # VMEM budget: resident params (single-buffered) + double-buffered in/out
    # tiles + live f32 intermediates + headroom, capped per generation
    # (~100 MiB on 128 MiB chips, 48 MiB on v7x's 64 MiB).
    mxu_bytes = prepped[0][0].dtype.itemsize
    d_out_pad = prepped[-1][0].shape[1]
    max_dpad = max([d_in_pad] + [w.shape[1] for (w, _) in prepped])
    param_bytes = sum(a.size * a.dtype.itemsize for layer in prepped for a in layer)
    act_bytes = 2 * tb * d_in_pad * mxu_bytes + 2 * tb * d_out_pad * 4
    live_bytes = 4 * tb * max_dpad * 4
    cap = (100 << 20) if vmem_cap >= (128 << 20) else (48 << 20)
    footprint = param_bytes + act_bytes + live_bytes + (8 << 20)
    vmem_limit = int(min(cap, max(32 << 20, footprint)))

    if hasattr(pl, "Buffered"):
        try:
            return _mlp_forward_impl(x, prepped, widths, tb, vmem_limit, 1)
        except Exception:
            pass  # fall back to default double-buffered parameter blocks
    vmem_limit = int(min(cap, max(32 << 20, footprint + param_bytes)))
    return _mlp_forward_impl(x, prepped, widths, tb, vmem_limit, 2)


def mlp_forward_ref(x, params):
    """Pure-f32 plain-JAX reference of the PyTorch forward."""
    for (w, b, g, beta) in params:
        y = jnp.maximum(x @ w.T + b, 0.0)
        mean = jnp.mean(y, axis=-1, keepdims=True)
        var = jnp.mean((y - mean) ** 2, axis=-1, keepdims=True)
        x = (y - mean) / jnp.sqrt(var + _LN_EPS) * g + beta
    return x


def mlp_forward_ref_mxu(x, params, mxu_dtype=jnp.bfloat16):
    """Reference applying the same MXU-input cast the kernel uses (tight check)."""
    for (w, b, g, beta) in params:
        y = jnp.dot(x.astype(mxu_dtype), w.T.astype(mxu_dtype),
                    preferred_element_type=jnp.float32) + b
        y = jnp.maximum(y, 0.0)
        mean = jnp.mean(y, axis=-1, keepdims=True)
        var = jnp.mean((y - mean) ** 2, axis=-1, keepdims=True)
        x = (y - mean) / jnp.sqrt(var + _LN_EPS) * g + beta
    return x


if __name__ == "__main__":
    key = jax.random.PRNGKey(0)
    k_params, k_x = jax.random.split(key)

    input_size = 16
    sizes = (32, 32)          # MLP(sizes=(32, 32), activation=torch.nn.ReLU), noise=False
    batch = 2

    params = init_mlp_params(k_params, input_size, sizes)
    prepped = prepare_params(params)                  # transpose / pad / pack / cast ONCE
    x = jax.random.normal(k_x, (batch, input_size), jnp.float32)

    out = jax.block_until_ready(mlp_forward(x, prepped, widths=tuple(sizes)))

    assert out.shape == (batch, sizes[-1])
    # Tight check vs. a reference using the same bf16 MXU-input precision.
    ref_same_prec = mlp_forward_ref_mxu(x, params)
    assert jnp.allclose(out, ref_same_prec, atol=1e-4, rtol=1e-4), "mismatch vs bf16-MXU reference"
    # Sanity check vs. the full-f32 torch-semantics reference (bf16 rounding only).
    ref_f32 = mlp_forward_ref(x, params)
    assert jnp.allclose(out, ref_f32, atol=1e-1), "diverged from f32 reference"

    # TODO(synk): NoisyLinear (noise=True branch) would add gaussian weight noise
    # in-kernel via pltpu.prng_seed / pltpu.prng_random_bits; the noise=False path
    # (standard torch.nn.Linear) is what is implemented here.
    print("KERNEL_OK")
</pallas_src>

<mosaic_0001>
module attributes {stable_mosaic.version = 11 : i64} {
  func.func @_mlp_kernel(%arg0: i32, %arg1: memref<8x128xbf16, #tpu.memory_space<vmem>>, %arg2: memref<128x128xbf16, #tpu.memory_space<vmem>>, %arg3: memref<3x128xf32, #tpu.memory_space<vmem>>, %arg4: memref<128x128xbf16, #tpu.memory_space<vmem>>, %arg5: memref<3x128xf32, #tpu.memory_space<vmem>>, %arg6: memref<8x128xf32, #tpu.memory_space<vmem>>) attributes {dimension_semantics = [#tpu.dimension_semantics<parallel>], iteration_bounds = array<i64: 1>, scalar_prefetch = 0 : i64, scratch_operands = 0 : i64, tpu.core_type = #tpu.core_type<tc>, window_params = [{transform_indices = @transform_0, window_bounds = array<i64: 8, 128>}, {pipeline_mode = #tpu.pipeline_mode<synchronous>, transform_indices = @transform_1, window_bounds = array<i64: 128, 128>}, {pipeline_mode = #tpu.pipeline_mode<synchronous>, transform_indices = @transform_2, window_bounds = array<i64: 3, 128>}, {pipeline_mode = #tpu.pipeline_mode<synchronous>, transform_indices = @transform_3, window_bounds = array<i64: 128, 128>}, {pipeline_mode = #tpu.pipeline_mode<synchronous>, transform_indices = @transform_4, window_bounds = array<i64: 3, 128>}, {transform_indices = @transform_5, window_bounds = array<i64: 8, 128>}]} {
    %c0 = arith.constant 0 : index
    %c0_0 = arith.constant 0 : index
    %0 = vector.load %arg1[%c0, %c0_0] : memref<8x128xbf16, #tpu.memory_space<vmem>>, vector<8x128xbf16>
    %c0_1 = arith.constant 0 : index
    %c0_2 = arith.constant 0 : index
    %1 = vector.load %arg3[%c0_1, %c0_2] : memref<3x128xf32, #tpu.memory_space<vmem>>, vector<3x128xf32>
    %c0_3 = arith.constant 0 : index
    %c0_4 = arith.constant 0 : index
    %2 = vector.load %arg2[%c0_3, %c0_4] : memref<128x128xbf16, #tpu.memory_space<vmem>>, vector<128x128xbf16>
    %cst = arith.constant dense<0.000000e+00> : vector<8x128xf32>
    %3 = tpu.matmul %0, %2, %cst {dimension_numbers = #tpu.dot_dimension_numbers<[1], [0], [0], [1], [0, 0, 1, 1], [], []>} : vector<8x128xbf16>, vector<128x128xbf16>, vector<8x128xf32> -> vector<8x128xf32>
    %4 = vector.extract_strided_slice %1 {offsets = [0, 0], sizes = [1, 128], strides = [1, 1]} : vector<3x128xf32> to vector<1x128xf32>
    %5 = vector.broadcast %4 : vector<1x128xf32> to vector<8x128xf32>
    %6 = arith.addf %3, %5 : vector<8x128xf32>
    %cst_5 = arith.constant 0.000000e+00 : f32
    %7 = vector.broadcast %cst_5 : f32 to vector<8x128xf32>
    %8 = arith.maximumf %6, %7 : vector<8x128xf32>
    %cst_6 = arith.constant dense<0.000000e+00> : vector<8xf32>
    %9 = vector.multi_reduction <add>, %8, %cst_6 [1] : vector<8x128xf32> to vector<8xf32>
    %10 = vector.shape_cast %9 : vector<8xf32> to vector<8x1xf32>
    %cst_7 = arith.constant 3.125000e-02 : f32
    %11 = vector.broadcast %cst_7 : f32 to vector<8x1xf32>
    %12 = arith.mulf %10, %11 : vector<8x1xf32>
    %13 = vector.broadcast %12 : vector<8x1xf32> to vector<8x128xf32>
    %14 = arith.subf %8, %13 : vector<8x128xf32>
    %15 = tpu.iota {dimensions = array<i32: 1>} : vector<1x128xi32>
    %c32_i32 = arith.constant 32 : i32
    %16 = vector.broadcast %c32_i32 : i32 to vector<1x128xi32>
    %17 = arith.cmpi slt, %15, %16 : vector<1x128xi32>
    %cst_8 = arith.constant 0.000000e+00 : f32
    %18 = vector.shape_cast %17 : vector<1x128xi1> to vector<1x128xi1>
    %19 = vector.broadcast %18 : vector<1x128xi1> to vector<8x128xi1>
    %20 = vector.broadcast %cst_8 : f32 to vector<8x128xf32>
    %21 = arith.select %19, %14, %20 : vector<8x128xi1>, vector<8x128xf32>
    %22 = arith.mulf %21, %21 : vector<8x128xf32>
    %cst_9 = arith.constant dense<0.000000e+00> : vector<8xf32>
    %23 = vector.multi_reduction <add>, %22, %cst_9 [1] : vector<8x128xf32> to vector<8xf32>
    %24 = vector.shape_cast %23 : vector<8xf32> to vector<8x1xf32>
    %cst_10 = arith.constant 3.125000e-02 : f32
    %25 = vector.broadcast %cst_10 : f32 to vector<8x1xf32>
    %26 = arith.mulf %24, %25 : vector<8x1xf32>
    %cst_11 = arith.constant 9.99999974E-6 : f32
    %27 = vector.broadcast %cst_11 : f32 to vector<8x1xf32>
    %28 = arith.addf %26, %27 : vector<8x1xf32>
    %29 = math.rsqrt %28 : vector<8x1xf32>
    %30 = vector.broadcast %29 : vector<8x1xf32> to vector<8x128xf32>
    %31 = arith.mulf %21, %30 : vector<8x128xf32>
    %32 = vector.extract_strided_slice %1 {offsets = [1, 0], sizes = [1, 128], strides = [1, 1]} : vector<3x128xf32> to vector<1x128xf32>
    %33 = vector.broadcast %32 : vector<1x128xf32> to vector<8x128xf32>
    %34 = arith.mulf %31, %33 : vector<8x128xf32>
    %35 = vector.extract_strided_slice %1 {offsets = [2, 0], sizes = [1, 128], strides = [1, 1]} : vector<3x128xf32> to vector<1x128xf32>
    %36 = vector.broadcast %35 : vector<1x128xf32> to vector<8x128xf32>
    %37 = arith.addf %34, %36 : vector<8x128xf32>
    %c0_12 = arith.constant 0 : index
    %c0_13 = arith.constant 0 : index
    %38 = vector.load %arg5[%c0_12, %c0_13] : memref<3x128xf32, #tpu.memory_space<vmem>>, vector<3x128xf32>
    %39 = arith.truncf %37 : vector<8x128xf32> to vector<8x128xbf16>
    %c0_14 = arith.constant 0 : index
    %c0_15 = arith.constant 0 : index
    %40 = vector.load %arg4[%c0_14, %c0_15] : memref<128x128xbf16, #tpu.memory_space<vmem>>, vector<128x128xbf16>
    %cst_16 = arith.constant dense<0.000000e+00> : vector<8x128xf32>
    %41 = tpu.matmul %39, %40, %cst_16 {dimension_numbers = #tpu.dot_dimension_numbers<[1], [0], [0], [1], [0, 0, 1, 1], [], []>} : vector<8x128xbf16>, vector<128x128xbf16>, vector<8x128xf32> -> vector<8x128xf32>
    %42 = vector.extract_strided_slice %38 {offsets = [0, 0], sizes = [1, 128], strides = [1, 1]} : vector<3x128xf32> to vector<1x128xf32>
    %43 = vector.broadcast %42 : vector<1x128xf32> to vector<8x128xf32>
    %44 = arith.addf %41, %43 : vector<8x128xf32>
    %cst_17 = arith.constant 0.000000e+00 : f32
    %45 = vector.broadcast %cst_17 : f32 to vector<8x128xf32>
    %46 = arith.maximumf %44, %45 : vector<8x128xf32>
    %cst_18 = arith.constant dense<0.000000e+00> : vector<8xf32>
    %47 = vector.multi_reduction <add>, %46, %cst_18 [1] : vector<8x128xf32> to vector<8xf32>
    %48 = vector.shape_cast %47 : vector<8xf32> to vector<8x1xf32>
    %cst_19 = arith.constant 3.125000e-02 : f32
    %49 = vector.broadcast %cst_19 : f32 to vector<8x1xf32>
    %50 = arith.mulf %48, %49 : vector<8x1xf32>
    %51 = vector.broadcast %50 : vector<8x1xf32> to vector<8x128xf32>
    %52 = arith.subf %46, %51 : vector<8x128xf32>
    %53 = tpu.iota {dimensions = array<i32: 1>} : vector<1x128xi32>
    %c32_i32_20 = arith.constant 32 : i32
    %54 = vector.broadcast %c32_i32_20 : i32 to vector<1x128xi32>
    %55 = arith.cmpi slt, %53, %54 : vector<1x128xi32>
    %cst_21 = arith.constant 0.000000e+00 : f32
    %56 = vector.shape_cast %55 : vector<1x128xi1> to vector<1x128xi1>
    %57 = vector.broadcast %56 : vector<1x128xi1> to vector<8x128xi1>
    %58 = vector.broadcast %cst_21 : f32 to vector<8x128xf32>
    %59 = arith.select %57, %52, %58 : vector<8x128xi1>, vector<8x128xf32>
    %60 = arith.mulf %59, %59 : vector<8x128xf32>
    %cst_22 = arith.constant dense<0.000000e+00> : vector<8xf32>
    %61 = vector.multi_reduction <add>, %60, %cst_22 [1] : vector<8x128xf32> to vector<8xf32>
    %62 = vector.shape_cast %61 : vector<8xf32> to vector<8x1xf32>
    %cst_23 = arith.constant 3.125000e-02 : f32
    %63 = vector.broadcast %cst_23 : f32 to vector<8x1xf32>
    %64 = arith.mulf %62, %63 : vector<8x1xf32>
    %cst_24 = arith.constant 9.99999974E-6 : f32
    %65 = vector.broadcast %cst_24 : f32 to vector<8x1xf32>
    %66 = arith.addf %64, %65 : vector<8x1xf32>
    %67 = math.rsqrt %66 : vector<8x1xf32>
    %68 = vector.broadcast %67 : vector<8x1xf32> to vector<8x128xf32>
    %69 = arith.mulf %59, %68 : vector<8x128xf32>
    %70 = vector.extract_strided_slice %38 {offsets = [1, 0], sizes = [1, 128], strides = [1, 1]} : vector<3x128xf32> to vector<1x128xf32>
    %71 = vector.broadcast %70 : vector<1x128xf32> to vector<8x128xf32>
    %72 = arith.mulf %69, %71 : vector<8x128xf32>
    %73 = vector.extract_strided_slice %38 {offsets = [2, 0], sizes = [1, 128], strides = [1, 1]} : vector<3x128xf32> to vector<1x128xf32>
    %74 = vector.broadcast %73 : vector<1x128xf32> to vector<8x128xf32>
    %75 = arith.addf %72, %74 : vector<8x128xf32>
    %c0_25 = arith.constant 0 : index
    %c0_26 = arith.constant 0 : index
    %76 = vector.load %arg6[%c0_25, %c0_26] : memref<8x128xf32, #tpu.memory_space<vmem>>, vector<8x128xf32>
    tpu.vector_store %arg6[%c0_25, %c0_26], %75 {strides = array<i32>} : memref<8x128xf32, #tpu.memory_space<vmem>>, vector<8x128xf32>,
    return
  }
  func.func @transform_0(%arg0: i32) -> (i32, i32) {
    %c0_i32 = arith.constant 0 : i32
    %c0_i32_0 = arith.constant 0 : i32
    return %arg0, %c0_i32 : i32, i32
  }
  func.func @transform_1(%arg0: i32) -> (i32, i32) {
    %c0_i32 = arith.constant 0 : i32
    %c0_i32_0 = arith.constant 0 : i32
    %c0_i32_1 = arith.constant 0 : i32
    return %c0_i32, %c0_i32_0 : i32, i32
  }
  func.func @transform_2(%arg0: i32) -> (i32, i32) {
    %c0_i32 = arith.constant 0 : i32
    %c0_i32_0 = arith.constant 0 : i32
    %c0_i32_1 = arith.constant 0 : i32
    return %c0_i32, %c0_i32_0 : i32, i32
  }
  func.func @transform_3(%arg0: i32) -> (i32, i32) {
    %c0_i32 = arith.constant 0 : i32
    %c0_i32_0 = arith.constant 0 : i32
    %c0_i32_1 = arith.constant 0 : i32
    return %c0_i32, %c0_i32_0 : i32, i32
  }
  func.func @transform_4(%arg0: i32) -> (i32, i32) {
    %c0_i32 = arith.constant 0 : i32
    %c0_i32_0 = arith.constant 0 : i32
    %c0_i32_1 = arith.constant 0 : i32
    return %c0_i32, %c0_i32_0 : i32, i32
  }
  func.func @transform_5(%arg0: i32) -> (i32, i32) {
    %c0_i32 = arith.constant 0 : i32
    %c0_i32_0 = arith.constant 0 : i32
    return %arg0, %c0_i32 : i32, i32
  }
}

module attributes {stable_mosaic.version = 11 : i64} {
  func.func @_mlp_kernel(%arg0: i32, %arg1: memref<8x128xbf16, #tpu.memory_space<vmem>>, %arg2: memref<128x128xbf16, #tpu.memory_space<vmem>>, %arg3: memref<3x128xf32, #tpu.memory_space<vmem>>, %arg4: memref<128x128xbf16, #tpu.memory_space<vmem>>, %arg5: memref<3x128xf32, #tpu.memory_space<vmem>>, %arg6: memref<8x128xf32, #tpu.memory_space<vmem>>) attributes {dimension_semantics = [#tpu.dimension_semantics<parallel>], iteration_bounds = array<i64: 1>, scalar_prefetch = 0 : i64, scratch_operands = 0 : i64, tpu.core_type = #tpu.core_type<tc>, window_params = [{transform_indices = @transform_0, window_bounds = array<i64: 8, 128>}, {pipeline_mode = #tpu.pipeline_mode<synchronous>, transform_indices = @transform_1, window_bounds = array<i64: 128, 128>}, {pipeline_mode = #tpu.pipeline_mode<synchronous>, transform_indices = @transform_2, window_bounds = array<i64: 3, 128>}, {pipeline_mode = #tpu.pipeline_mode<synchronous>, transform_indices = @transform_3, window_bounds = array<i64: 128, 128>}, {pipeline_mode = #tpu.pipeline_mode<synchronous>, transform_indices = @transform_4, window_bounds = array<i64: 3, 128>}, {transform_indices = @transform_5, window_bounds = array<i64: 8, 128>}]} {
    %c0 = arith.constant 0 : index
    %c0_0 = arith.constant 0 : index
    %0 = vector.load %arg1[%c0, %c0_0] : memref<8x128xbf16, #tpu.memory_space<vmem>>, vector<8x128xbf16>
    %c0_1 = arith.constant 0 : index
    %c0_2 = arith.constant 0 : index
    %1 = vector.load %arg3[%c0_1, %c0_2] : memref<3x128xf32, #tpu.memory_space<vmem>>, vector<3x128xf32>
    %c0_3 = arith.constant 0 : index
    %c0_4 = arith.constant 0 : index
    %2 = vector.load %arg2[%c0_3, %c0_4] : memref<128x128xbf16, #tpu.memory_space<vmem>>, vector<128x128xbf16>
    %cst = arith.constant dense<0.000000e+00> : vector<8x128xf32>
    %3 = tpu.matmul %0, %2, %cst {dimension_numbers = #tpu.dot_dimension_numbers<[1], [0], [0], [1], [0, 0, 1, 1], [], []>} : vector<8x128xbf16>, vector<128x128xbf16>, vector<8x128xf32> -> vector<8x128xf32>
    %4 = vector.extract_strided_slice %1 {offsets = [0, 0], sizes = [1, 128], strides = [1, 1]} : vector<3x128xf32> to vector<1x128xf32>
    %5 = vector.broadcast %4 : vector<1x128xf32> to vector<8x128xf32>
    %6 = arith.addf %3, %5 : vector<8x128xf32>
    %cst_5 = arith.constant 0.000000e+00 : f32
    %7 = vector.broadcast %cst_5 : f32 to vector<8x128xf32>
    %8 = arith.maximumf %6, %7 : vector<8x128xf32>
    %cst_6 = arith.constant dense<0.000000e+00> : vector<8xf32>
    %9 = vector.multi_reduction <add>, %8, %cst_6 [1] : vector<8x128xf32> to vector<8xf32>
    %10 = vector.shape_cast %9 : vector<8xf32> to vector<8x1xf32>
    %cst_7 = arith.constant 3.125000e-02 : f32
    %11 = vector.broadcast %cst_7 : f32 to vector<8x1xf32>
    %12 = arith.mulf %10, %11 : vector<8x1xf32>
    %13 = vector.broadcast %12 : vector<8x1xf32> to vector<8x128xf32>
    %14 = arith.subf %8, %13 : vector<8x128xf32>
    %15 = tpu.iota {dimensions = array<i32: 1>} : vector<1x128xi32>
    %c32_i32 = arith.constant 32 : i32
    %16 = vector.broadcast %c32_i32 : i32 to vector<1x128xi32>
    %17 = arith.cmpi slt, %15, %16 : vector<1x128xi32>
    %cst_8 = arith.constant 0.000000e+00 : f32
    %18 = vector.shape_cast %17 : vector<1x128xi1> to vector<1x128xi1>
    %19 = vector.broadcast %18 : vector<1x128xi1> to vector<8x128xi1>
    %20 = vector.broadcast %cst_8 : f32 to vector<8x128xf32>
    %21 = arith.select %19, %14, %20 : vector<8x128xi1>, vector<8x128xf32>
    %22 = arith.mulf %21, %21 : vector<8x128xf32>
    %cst_9 = arith.constant dense<0.000000e+00> : vector<8xf32>
    %23 = vector.multi_reduction <add>, %22, %cst_9 [1] : vector<8x128xf32> to vector<8xf32>
    %24 = vector.shape_cast %23 : vector<8xf32> to vector<8x1xf32>
    %cst_10 = arith.constant 3.125000e-02 : f32
    %25 = vector.broadcast %cst_10 : f32 to vector<8x1xf32>
    %26 = arith.mulf %24, %25 : vector<8x1xf32>
    %cst_11 = arith.constant 9.99999974E-6 : f32
    %27 = vector.broadcast %cst_11 : f32 to vector<8x1xf32>
    %28 = arith.addf %26, %27 : vector<8x1xf32>
    %29 = math.rsqrt %28 : vector<8x1xf32>
    %30 = vector.broadcast %29 : vector<8x1xf32> to vector<8x128xf32>
    %31 = arith.mulf %21, %30 : vector<8x128xf32>
    %32 = vector.extract_strided_slice %1 {offsets = [1, 0], sizes = [1, 128], strides = [1, 1]} : vector<3x128xf32> to vector<1x128xf32>
    %33 = vector.broadcast %32 : vector<1x128xf32> to vector<8x128xf32>
    %34 = arith.mulf %31, %33 : vector<8x128xf32>
    %35 = vector.extract_strided_slice %1 {offsets = [2, 0], sizes = [1, 128], strides = [1, 1]} : vector<3x128xf32> to vector<1x128xf32>
    %36 = vector.broadcast %35 : vector<1x128xf32> to vector<8x128xf32>
    %37 = arith.addf %34, %36 : vector<8x128xf32>
    %c0_12 = arith.constant 0 : index
    %c0_13 = arith.constant 0 : index
    %38 = vector.load %arg5[%c0_12, %c0_13] : memref<3x128xf32, #tpu.memory_space<vmem>>, vector<3x128xf32>
    %39 = arith.truncf %37 : vector<8x128xf32> to vector<8x128xbf16>
    %c0_14 = arith.constant 0 : index
    %c0_15 = arith.constant 0 : index
    %40 = vector.load %arg4[%c0_14, %c0_15] : memref<128x128xbf16, #tpu.memory_space<vmem>>, vector<128x128xbf16>
    %cst_16 = arith.constant dense<0.000000e+00> : vector<8x128xf32>
    %41 = tpu.matmul %39, %40, %cst_16 {dimension_numbers = #tpu.dot_dimension_numbers<[1], [0], [0], [1], [0, 0, 1, 1], [], []>} : vector<8x128xbf16>, vector<128x128xbf16>, vector<8x128xf32> -> vector<8x128xf32>
    %42 = vector.extract_strided_slice %38 {offsets = [0, 0], sizes = [1, 128], strides = [1, 1]} : vector<3x128xf32> to vector<1x128xf32>
    %43 = vector.broadcast %42 : vector<1x128xf32> to vector<8x128xf32>
    %44 = arith.addf %41, %43 : vector<8x128xf32>
    %cst_17 = arith.constant 0.000000e+00 : f32
    %45 = vector.broadcast %cst_17 : f32 to vector<8x128xf32>
    %46 = arith.maximumf %44, %45 : vector<8x128xf32>
    %cst_18 = arith.constant dense<0.000000e+00> : vector<8xf32>
    %47 = vector.multi_reduction <add>, %46, %cst_18 [1] : vector<8x128xf32> to vector<8xf32>
    %48 = vector.shape_cast %47 : vector<8xf32> to vector<8x1xf32>
    %cst_19 = arith.constant 3.125000e-02 : f32
    %49 = vector.broadcast %cst_19 : f32 to vector<8x1xf32>
    %50 = arith.mulf %48, %49 : vector<8x1xf32>
    %51 = vector.broadcast %50 : vector<8x1xf32> to vector<8x128xf32>
    %52 = arith.subf %46, %51 : vector<8x128xf32>
    %53 = tpu.iota {dimensions = array<i32: 1>} : vector<1x128xi32>
    %c32_i32_20 = arith.constant 32 : i32
    %54 = vector.broadcast %c32_i32_20 : i32 to vector<1x128xi32>
    %55 = arith.cmpi slt, %53, %54 : vector<1x128xi32>
    %cst_21 = arith.constant 0.000000e+00 : f32
    %56 = vector.shape_cast %55 : vector<1x128xi1> to vector<1x128xi1>
    %57 = vector.broadcast %56 : vector<1x128xi1> to vector<8x128xi1>
    %58 = vector.broadcast %cst_21 : f32 to vector<8x128xf32>
    %59 = arith.select %57, %52, %58 : vector<8x128xi1>, vector<8x128xf32>
    %60 = arith.mulf %59, %59 : vector<8x128xf32>
    %cst_22 = arith.constant dense<0.000000e+00> : vector<8xf32>
    %61 = vector.multi_reduction <add>, %60, %cst_22 [1] : vector<8x128xf32> to vector<8xf32>
    %62 = vector.shape_cast %61 : vector<8xf32> to vector<8x1xf32>
    %cst_23 = arith.constant 3.125000e-02 : f32
    %63 = vector.broadcast %cst_23 : f32 to vector<8x1xf32>
    %64 = arith.mulf %62, %63 : vector<8x1xf32>
    %cst_24 = arith.constant 9.99999974E-6 : f32
    %65 = vector.broadcast %cst_24 : f32 to vector<8x1xf32>
    %66 = arith.addf %64, %65 : vector<8x1xf32>
    %67 = math.rsqrt %66 : vector<8x1xf32>
    %68 = vector.broadcast %67 : vector<8x1xf32> to vector<8x128xf32>
    %69 = arith.mulf %59, %68 : vector<8x128xf32>
    %70 = vector.extract_strided_slice %38 {offsets = [1, 0], sizes = [1, 128], strides = [1, 1]} : vector<3x128xf32> to vector<1x128xf32>
    %71 = vector.broadcast %70 : vector<1x128xf32> to vector<8x128xf32>
    %72 = arith.mulf %69, %71 : vector<8x128xf32>
    %73 = vector.extract_strided_slice %38 {offsets = [2, 0], sizes = [1, 128], strides = [1, 1]} : vector<3x128xf32> to vector<1x128xf32>
    %74 = vector.broadcast %73 : vector<1x128xf32> to vector<8x128xf32>
    %75 = arith.addf %72, %74 : vector<8x128xf32>
    %c0_25 = arith.constant 0 : index
    %c0_26 = arith.constant 0 : index
    %76 = vector.load %arg6[%c0_25, %c0_26] : memref<8x128xf32, #tpu.memory_space<vmem>>, vector<8x128xf32>
    tpu.vector_store %arg6[%c0_25, %c0_26], %75 {strides = array<i32>} : memref<8x128xf32, #tpu.memory_space<vmem>>, vector<8x128xf32>,
    return
  }
  func.func @transform_0(%arg0: i32) -> (i32, i32) {
    %c0_i32 = arith.constant 0 : i32
    %c0_i32_0 = arith.constant 0 : i32
    return %arg0, %c0_i32 : i32, i32
  }
  func.func @transform_1(%arg0: i32) -> (i32, i32) {
    %c0_i32 = arith.constant 0 : i32
    %c0_i32_0 = arith.constant 0 : i32
    %c0_i32_1 = arith.constant 0 : i32
    return %c0_i32, %c0_i32_0 : i32, i32
  }
  func.func @transform_2(%arg0: i32) -> (i32, i32) {
    %c0_i32 = arith.constant 0 : i32
    %c0_i32_0 = arith.constant 0 : i32
    %c0_i32_1 = arith.constant 0 : i32
    return %c0_i32, %c0_i32_0 : i32, i32
  }
  func.func @transform_3(%arg0: i32) -> (i32, i32) {
    %c0_i32 = arith.constant 0 : i32
    %c0_i32_0 = arith.constant 0 : i32
    %c0_i32_1 = arith.constant 0 : i32
    return %c0_i32, %c0_i32_0 : i32, i32
  }
  func.func @transform_4(%arg0: i32) -> (i32, i32) {
    %c0_i32 = arith.constant 0 : i32
    %c0_i32_0 = arith.constant 0 : i32
    %c0_i32_1 = arith.constant 0 : i32
    return %c0_i32, %c0_i32_0 : i32, i32
  }
  func.func @transform_5(%arg0: i32) -> (i32, i32) {
    %c0_i32 = arith.constant 0 : i32
    %c0_i32_0 = arith.constant 0 : i32
    return %arg0, %c0_i32 : i32, i32
  }
}

</mosaic_0001>

<bundles_post_ra>
// kernel: _mlp_forward_impl.1
= control target key start
LH: loop header
LB: loop body
LE: loop exit
PB: predicated region body
PF: predicated region fallthrough
CT: control target
= control target key end

     0   :  { %10 = vsyncpa [#allocation3], 0  ;;  %s470_s0 = inlined_call_operand.vmem [shape: bf16[8,128], index: 0, kind: input, shape index: {}]   ;;  %s471_s1 = inlined_call_operand.hbm [shape: bf16[128,128], index: 1, kind: input, shape index: {}]   ;;  %s472_s2 = inlined_call_operand.vmem [shape: f32[3,128], index: 2, kind: input, shape index: {}]   ;;  %s473_s3 = inlined_call_operand.hbm [shape: bf16[128,128], index: 3, kind: input, shape index: {}]   ;;  %s474_s4 = inlined_call_operand.vmem [shape: f32[3,128], index: 4, kind: input, shape index: {}]   ;;  %s475_s5 = inlined_call_operand.vmem [shape: f32[8,128], index: 5, kind: output, shape index: {}]  }
   0x1   :  { %s18_s20 = sshll.u32 %s471_s1, 4  ;;  %s19_s20 = int_to_ptr.hbm [resolvable:$true] %s18_s20 }
   0x2   :  { %11 = vsyncpa [#allocation5], 0  ;;  %s416_s21 = smov [#allocation2]   ;;  %s33_s25 = sshll.u32 %s473_s3, 4  ;;  %s34_s25 = int_to_ptr.hbm [resolvable:$true] %s33_s25 }
   0x3   :  { %s20_s22 = sshll.u32 %s416_s21, 4  ;;  %s417_s26 = smov 64   ;;  %s21_s22 = int_to_ptr.vmem [resolvable:$true] %s20_s22 }
   0x4   :  { %s418_s27 = smov 4   ;;  %s419_s28 = smov [#allocation4]  }
   0x5   :  { %26 = dma.hbm_to_vmem [thread:$0]  %s19_s20, 1024, %s21_s22, [#allocation3], %s417_s26, %s417_s26, %s418_s27  }
   0x6   :  { %s35_s29 = sshll.u32 %s419_s28, 4  ;;  %s36_s29 = int_to_ptr.vmem [resolvable:$true] %s35_s29 }
   0x7   :  { %41 = dma.hbm_to_vmem [thread:$0]  %s34_s25, 1024, %s36_s29, [#allocation5], %s417_s26, %s417_s26, %s418_s27  }
   0x8   :  { %412 = dma.done.wait [#allocation3], 1024  }
   0x9   :  { %413 = vsyncadd [#allocation3], 4294966272 }
   0xa   :  { %414 = dma.done.wait [#allocation5], 1024  }
   0xb   :  { %415 = vsyncadd [#allocation5], 4294966272  ;;  %v347_v0 = vld [vmem:[#allocation2 + $0x38] sm:$0xff]  ;;  %v346_v1 = vld [vmem:[#allocation2 + $0x30] sm:$0xff]  ;;  %v137_v16 = vlaneseq }
   0xc   :  { %119 = vmatpush.bf16.msra.mxu0 %v347_v0  ;;  %v345_v2 = vld [vmem:[#allocation2 + $0x28] sm:$0xff]  ;;  %v344_v3 = vld [vmem:[#allocation2 + $0x20] sm:$0xff]  ;;  %v343_v4 = vld [vmem:[#allocation2 + $0x18] sm:$0xff] }
   0xd   :  { %v342_v5 = vld [vmem:[#allocation2 + $0x10] sm:$0xff]  ;;  %v341_v6 = vld [vmem:[#allocation2 + $0x8] sm:$0xff]  ;;  %v340_v7 = vld [vmem:[#allocation2] sm:$0xff]  ;;  %v138_v17 = vand.u32 127, %v137_v16 }
   0xe   :  { %v52_v8 = vld [vmem:[%s470_s0] sm:$0xf]  ;;  %v355_v15 = vld [vmem:[#allocation4 + $0x38] sm:$0xff]  ;;  %v354_v23 = vld [vmem:[#allocation4 + $0x30] sm:$0xff] }
   0xf   :  { %v53_v9 = vld [vmem:[%s472_s2] sm:$0x7]  ;;  %230 = vmatpush.bf16.msra.mxu1 %v355_v15  ;;  %vm139_vm0 = vcmp.lt.s32.totalorder %v138_v17, 32  ;;  %v353_v24 = vld [vmem:[#allocation4 + $0x28] sm:$0xff]  ;;  %v351_v26 = vld [vmem:[#allocation4 + $0x18] sm:$0xff] }
  0x10   :  { %120 = vmatpush.bf16.msra.mxu0 %v346_v1  ;;  %v70_v10 = vperm.slane %v53_v9, 0  ;;  %v352_v25 = vld [vmem:[#allocation4 + $0x20] sm:$0xff]  ;;  %v350_v27 = vld [vmem:[#allocation4 + $0x10] sm:$0xff]  ;;  %v349_v28 = vld [vmem:[#allocation4 + $0x8] sm:$0xff]  ;;  %v159_v39 = vperm.slane %v53_v9, 1  ;;  %v161_v42 = vperm.slane %v53_v9, 2 }
  0x11   :  { %v348_v29 = vld [vmem:[#allocation4] sm:$0xff] }
  0x12   :  { %v163_v46 = vld [vmem:[%s474_s4] sm:$0x7] }
  0x13   :  { %231 = vmatpush.bf16.msra.mxu1 %v354_v23  ;;  %v181_v47 = vperm.slane %v163_v46, 0 }
  0x14   :  { %121 = vmatpush.bf16.msra.mxu0 %v345_v2  ;;  %v265_v2 = vperm.slane %v163_v46, 1 }
  0x17   :  { %232 = vmatpush.bf16.msra.mxu1 %v353_v24 }
  0x18   :  { %122 = vmatpush.bf16.msra.mxu0 %v344_v3 }
  0x1b   :  { %233 = vmatpush.bf16.msra.mxu1 %v352_v25 }
  0x1c   :  { %123 = vmatpush.bf16.msra.mxu0 %v343_v4  ;;  %v267_v4 = vperm.slane %v163_v46, 2 }
  0x1f   :  { %234 = vmatpush.bf16.msra.mxu1 %v351_v26 }
  0x20   :  { %124 = vmatpush.bf16.msra.mxu0 %v342_v5 }
  0x23   :  { %235 = vmatpush.bf16.msra.mxu1 %v350_v27 }
  0x24   :  { %125 = vmatpush.bf16.msra.mxu0 %v341_v6 }
  0x27   :  { %236 = vmatpush.bf16.msra.mxu1 %v349_v28 }
  0x28   :  { %126 = vmatpush.bf16.msra.mxu0 %v340_v7 }
  0x2b   :  { %127 = vmatmul.bf16.vlgmr.msra.gmra.mxu0 %v52_v8  ;;  %237 = vmatpush.bf16.msra.mxu1 %v348_v29 }
  0xa8   :  { %v128_v11 = vpop.f32.mrf.mxu0 }
  0xa9   :  { %v129_v12 = vadd.f32 %v128_v11, %v70_v10 }
  0xab   :  { %v132_v13 = vmax.f32 %v129_v12, 0.0 }
  0xad   :  { %133 = vadd.xlane.f32.xlu0 %v132_v13 }
  0xb0   :  { %v130_v14 = vpop.f32.mrf.mxu0 }
 0x120   :  { %v134_v18 = vpop.xlane.xlu0 %133 }
 0x121   :  { %v135_v19 = vmul.f32 0.03125, %v134_v18 }
 0x123   :  { %v136_v20 = vsub.f32 %v132_v13, %v135_v19 }
 0x125   :  { %v142_v21 = vsel %vm139_vm0, %v136_v20, 0.0 }
 0x126   :  { %v143_v22 = vmul.f32 %v142_v21, %v142_v21 }
 0x128   :  { %144 = vadd.xlane.f32.xlu0 %v143_v22 }
 0x19b   :  { %v145_v30 = vpop.xlane.xlu0 %144 }
 0x19c   :  { %v146_v31 = vmul.f32 0.03125, %v145_v30 }
 0x19e   :  { %v147_v32 = vadd.f32 1e-05, %v146_v31 }
 0x1a0   :  { %360 = vrsqrt.f32 %v147_v32  ;;  %vm154_vm2 = vweird.f32 %v147_v32 }
 0x1a6   :  { %v361_v33 = vpop.eup %360 }
 0x1a7   :  { %v149_v34 = vmul.f32 %v361_v33, %v147_v32  ;;  %vm155_vm1 = vweird.f32 %v361_v33 }
 0x1a8   :  { %vm156_vm3 = vmor %vm154_vm2, %vm155_vm1 }
 0x1a9   :  { %v150_v35 = vmul.f32 %v361_v33, %v149_v34 }
 0x1ab   :  { %v151_v36 = vmul.f32 0.5, %v150_v35 }
 0x1ad   :  { %v152_v37 = vsub.f32 1.5, %v151_v36 }
 0x1af   :  { %v153_v38 = vmul.f32 %v361_v33, %v152_v37 }
 0x1b1   :  { %v157_v40 = vsel %vm156_vm3, %v361_v33, %v153_v38 }
 0x1b2   :  { %v158_v41 = vmul.f32 %v157_v40, %v142_v21 }
 0x1b4   :  { %v160_v43 = vmul.f32 %v159_v39, %v158_v41 }
 0x1b6   :  { %v162_v44 = vadd.f32 %v161_v42, %v160_v43 }
 0x1b8   :  { %v164_v45 = vpack.c.bf16 %v162_v44, %v162_v44 }
 0x1ba   :  { %238 = vmatmul.bf16.vlgmr.msra.gmra.mxu1 %v164_v45 }
 0x237   :  { %v239_v48 = vpop.f32.mrf.mxu1 }
 0x238   :  { %v240_v49 = vadd.f32 %v239_v48, %v181_v47 }
 0x23a   :  { %v243_v50 = vmax.f32 %v240_v49, 0.0 }
 0x23c   :  { %244 = vadd.xlane.f32.xlu1 %v243_v50 }
 0x23f   :  { %v241_v51 = vpop.f32.mrf.mxu1 }
 0x2af   :  { %v245_v52 = vpop.xlane.xlu1 %244 }
 0x2b0   :  { %v246_v53 = vmul.f32 0.03125, %v245_v52 }
 0x2b2   :  { %v247_v54 = vsub.f32 %v243_v50, %v246_v53 }
 0x2b4   :  { %v248_v55 = vsel %vm139_vm0, %v247_v54, 0.0 }
 0x2b5   :  { %v249_v56 = vmul.f32 %v248_v55, %v248_v55 }
 0x2b7   :  { %250 = vadd.xlane.f32.xlu1 %v249_v56 }
 0x32a   :  { %v251_v57 = vpop.xlane.xlu1 %250 }
 0x32b   :  { %v252_v58 = vmul.f32 0.03125, %v251_v57 }
 0x32d   :  { %v253_v59 = vadd.f32 1e-05, %v252_v58 }
 0x32f   :  { %362 = vrsqrt.f32 %v253_v59  ;;  %vm260_vm5 = vweird.f32 %v253_v59 }
 0x335   :  { %v363_v60 = vpop.eup %362 }
 0x336   :  { %v255_v61 = vmul.f32 %v363_v60, %v253_v59  ;;  %vm261_vm4 = vweird.f32 %v363_v60 }
 0x337   :  { %vm262_vm6 = vmor %vm260_vm5, %vm261_vm4 }
 0x338   :  { %v256_v62 = vmul.f32 %v363_v60, %v255_v61 }
 0x33a   :  { %v257_v63 = vmul.f32 0.5, %v256_v62 }
 0x33c   :  { %v258_v0 = vsub.f32 1.5, %v257_v63 }
 0x33e   :  { %v259_v1 = vmul.f32 %v363_v60, %v258_v0 }
 0x340   :  { %v263_v3 = vsel %vm262_vm6, %v363_v60, %v259_v1 }
 0x341   :  { %v264_v5 = vmul.f32 %v263_v3, %v248_v55 }
 0x343   :  { %v266_v6 = vmul.f32 %v265_v2, %v264_v5 }
 0x345   :  { %v268_v7 = vadd.f32 %v267_v4, %v266_v6 }
 0x347   :  { %269 = vst [vmem:[%s475_s5] sm:$0xff] %v268_v7 }
 0x348   :  { %274 = vsyncpa [#allocation3], 1 }
 0x349   :  { %275 = vsyncpa [#allocation5], 1 }

// kernel: _mlp_forward_impl.1
= control target key start
LH: loop header
LB: loop body
LE: loop exit
PB: predicated region body
PF: predicated region fallthrough
CT: control target
= control target key end

     0   :  { %10 = vsyncpa [#allocation3], 0  ;;  %s470_s0 = inlined_call_operand.vmem [shape: bf16[8,128], index: 0, kind: input, shape index: {}]   ;;  %s471_s1 = inlined_call_operand.hbm [shape: bf16[128,128], index: 1, kind: input, shape index: {}]   ;;  %s472_s2 = inlined_call_operand.vmem [shape: f32[3,128], index: 2, kind: input, shape index: {}]   ;;  %s473_s3 = inlined_call_operand.hbm [shape: bf16[128,128], index: 3, kind: input, shape index: {}]   ;;  %s474_s4 = inlined_call_operand.vmem [shape: f32[3,128], index: 4, kind: input, shape index: {}]   ;;  %s475_s5 = inlined_call_operand.vmem [shape: f32[8,128], index: 5, kind: output, shape index: {}]  }
   0x1   :  { %s18_s20 = sshll.u32 %s471_s1, 4  ;;  %s19_s20 = int_to_ptr.hbm [resolvable:$true] %s18_s20 }
   0x2   :  { %11 = vsyncpa [#allocation5], 0  ;;  %s416_s21 = smov [#allocation2]   ;;  %s33_s25 = sshll.u32 %s473_s3, 4  ;;  %s34_s25 = int_to_ptr.hbm [resolvable:$true] %s33_s25 }
   0x3   :  { %s20_s22 = sshll.u32 %s416_s21, 4  ;;  %s417_s26 = smov 64   ;;  %s21_s22 = int_to_ptr.vmem [resolvable:$true] %s20_s22 }
   0x4   :  { %s418_s27 = smov 4   ;;  %s419_s28 = smov [#allocation4]  }
   0x5   :  { %26 = dma.hbm_to_vmem [thread:$0]  %s19_s20, 1024, %s21_s22, [#allocation3], %s417_s26, %s417_s26, %s418_s27  }
   0x6   :  { %s35_s29 = sshll.u32 %s419_s28, 4  ;;  %s36_s29 = int_to_ptr.vmem [resolvable:$true] %s35_s29 }
   0x7   :  { %41 = dma.hbm_to_vmem [thread:$0]  %s34_s25, 1024, %s36_s29, [#allocation5], %s417_s26, %s417_s26, %s418_s27  }
   0x8   :  { %412 = dma.done.wait [#allocation3], 1024  }
   0x9   :  { %413 = vsyncadd [#allocation3], 4294966272 }
   0xa   :  { %414 = dma.done.wait [#allocation5], 1024  }
   0xb   :  { %415 = vsyncadd [#allocation5], 4294966272  ;;  %v347_v0 = vld [vmem:[#allocation2 + $0x38] sm:$0xff]  ;;  %v346_v1 = vld [vmem:[#allocation2 + $0x30] sm:$0xff]  ;;  %v137_v16 = vlaneseq }
   0xc   :  { %119 = vmatpush.bf16.msra.mxu0 %v347_v0  ;;  %v345_v2 = vld [vmem:[#allocation2 + $0x28] sm:$0xff]  ;;  %v344_v3 = vld [vmem:[#allocation2 + $0x20] sm:$0xff]  ;;  %v343_v4 = vld [vmem:[#allocation2 + $0x18] sm:$0xff] }
   0xd   :  { %v342_v5 = vld [vmem:[#allocation2 + $0x10] sm:$0xff]  ;;  %v341_v6 = vld [vmem:[#allocation2 + $0x8] sm:$0xff]  ;;  %v340_v7 = vld [vmem:[#allocation2] sm:$0xff]  ;;  %v138_v17 = vand.u32 127, %v137_v16 }
   0xe   :  { %v52_v8 = vld [vmem:[%s470_s0] sm:$0xf]  ;;  %v355_v15 = vld [vmem:[#allocation4 + $0x38] sm:$0xff]  ;;  %v354_v23 = vld [vmem:[#allocation4 + $0x30] sm:$0xff] }
   0xf   :  { %v53_v9 = vld [vmem:[%s472_s2] sm:$0x7]  ;;  %230 = vmatpush.bf16.msra.mxu1 %v355_v15  ;;  %vm139_vm0 = vcmp.lt.s32.totalorder %v138_v17, 32  ;;  %v353_v24 = vld [vmem:[#allocation4 + $0x28] sm:$0xff]  ;;  %v351_v26 = vld [vmem:[#allocation4 + $0x18] sm:$0xff] }
  0x10   :  { %120 = vmatpush.bf16.msra.mxu0 %v346_v1  ;;  %v70_v10 = vperm.slane %v53_v9, 0  ;;  %v352_v25 = vld [vmem:[#allocation4 + $0x20] sm:$0xff]  ;;  %v350_v27 = vld [vmem:[#allocation4 + $0x10] sm:$0xff]  ;;  %v349_v28 = vld [vmem:[#allocation4 + $0x8] sm:$0xff]  ;;  %v159_v39 = vperm.slane %v53_v9, 1  ;;  %v161_v42 = vperm.slane %v53_v9, 2 }
  0x11   :  { %v348_v29 = vld [vmem:[#allocation4] sm:$0xff] }
  0x12   :  { %v163_v46 = vld [vmem:[%s474_s4] sm:$0x7] }
  0x13   :  { %231 = vmatpush.bf16.msra.mxu1 %v354_v23  ;;  %v181_v47 = vperm.slane %v163_v46, 0 }
  0x14   :  { %121 = vmatpush.bf16.msra.mxu0 %v345_v2  ;;  %v265_v2 = vperm.slane %v163_v46, 1 }
  0x17   :  { %232 = vmatpush.bf16.msra.mxu1 %v353_v24 }
  0x18   :  { %122 = vmatpush.bf16.msra.mxu0 %v344_v3 }
  0x1b   :  { %233 = vmatpush.bf16.msra.mxu1 %v352_v25 }
  0x1c   :  { %123 = vmatpush.bf16.msra.mxu0 %v343_v4  ;;  %v267_v4 = vperm.slane %v163_v46, 2 }
  0x1f   :  { %234 = vmatpush.bf16.msra.mxu1 %v351_v26 }
  0x20   :  { %124 = vmatpush.bf16.msra.mxu0 %v342_v5 }
  0x23   :  { %235 = vmatpush.bf16.msra.mxu1 %v350_v27 }
  0x24   :  { %125 = vmatpush.bf16.msra.mxu0 %v341_v6 }
  0x27   :  { %236 = vmatpush.bf16.msra.mxu1 %v349_v28 }
  0x28   :  { %126 = vmatpush.bf16.msra.mxu0 %v340_v7 }
  0x2b   :  { %127 = vmatmul.bf16.vlgmr.msra.gmra.mxu0 %v52_v8  ;;  %237 = vmatpush.bf16.msra.mxu1 %v348_v29 }
  0xa8   :  { %v128_v11 = vpop.f32.mrf.mxu0 }
  0xa9   :  { %v129_v12 = vadd.f32 %v128_v11, %v70_v10 }
  0xab   :  { %v132_v13 = vmax.f32 %v129_v12, 0.0 }
  0xad   :  { %133 = vadd.xlane.f32.xlu0 %v132_v13 }
  0xb0   :  { %v130_v14 = vpop.f32.mrf.mxu0 }
 0x120   :  { %v134_v18 = vpop.xlane.xlu0 %133 }
 0x121   :  { %v135_v19 = vmul.f32 0.03125, %v134_v18 }
 0x123   :  { %v136_v20 = vsub.f32 %v132_v13, %v135_v19 }
 0x125   :  { %v142_v21 = vsel %vm139_vm0, %v136_v20, 0.0 }
 0x126   :  { %v143_v22 = vmul.f32 %v142_v21, %v142_v21 }
 0x128   :  { %144 = vadd.xlane.f32.xlu0 %v143_v22 }
 0x19b   :  { %v145_v30 = vpop.xlane.xlu0 %144 }
 0x19c   :  { %v146_v31 = vmul.f32 0.03125, %v145_v30 }
 0x19e   :  { %v147_v32 = vadd.f32 1e-05, %v146_v31 }
 0x1a0   :  { %360 = vrsqrt.f32 %v147_v32  ;;  %vm154_vm2 = vweird.f32 %v147_v32 }
 0x1a6   :  { %v361_v33 = vpop.eup %360 }
 0x1a7   :  { %v149_v34 = vmul.f32 %v361_v33, %v147_v32  ;;  %vm155_vm1 = vweird.f32 %v361_v33 }
 0x1a8   :  { %vm156_vm3 = vmor %vm154_vm2, %vm155_vm1 }
 0x1a9   :  { %v150_v35 = vmul.f32 %v361_v33, %v149_v34 }
 0x1ab   :  { %v151_v36 = vmul.f32 0.5, %v150_v35 }
 0x1ad   :  { %v152_v37 = vsub.f32 1.5, %v151_v36 }
 0x1af   :  { %v153_v38 = vmul.f32 %v361_v33, %v152_v37 }
 0x1b1   :  { %v157_v40 = vsel %vm156_vm3, %v361_v33, %v153_v38 }
 0x1b2   :  { %v158_v41 = vmul.f32 %v157_v40, %v142_v21 }
 0x1b4   :  { %v160_v43 = vmul.f32 %v159_v39, %v158_v41 }
 0x1b6   :  { %v162_v44 = vadd.f32 %v161_v42, %v160_v43 }
 0x1b8   :  { %v164_v45 = vpack.c.bf16 %v162_v44, %v162_v44 }
 0x1ba   :  { %238 = vmatmul.bf16.vlgmr.msra.gmra.mxu1 %v164_v45 }
 0x237   :  { %v239_v48 = vpop.f32.mrf.mxu1 }
 0x238   :  { %v240_v49 = vadd.f32 %v239_v48, %v181_v47 }
 0x23a   :  { %v243_v50 = vmax.f32 %v240_v49, 0.0 }
 0x23c   :  { %244 = vadd.xlane.f32.xlu1 %v243_v50 }
 0x23f   :  { %v241_v51 = vpop.f32.mrf.mxu1 }
 0x2af   :  { %v245_v52 = vpop.xlane.xlu1 %244 }
 0x2b0   :  { %v246_v53 = vmul.f32 0.03125, %v245_v52 }
 0x2b2   :  { %v247_v54 = vsub.f32 %v243_v50, %v246_v53 }
 0x2b4   :  { %v248_v55 = vsel %vm139_vm0, %v247_v54, 0.0 }
 0x2b5   :  { %v249_v56 = vmul.f32 %v248_v55, %v248_v55 }
 0x2b7   :  { %250 = vadd.xlane.f32.xlu1 %v249_v56 }
 0x32a   :  { %v251_v57 = vpop.xlane.xlu1 %250 }
 0x32b   :  { %v252_v58 = vmul.f32 0.03125, %v251_v57 }
 0x32d   :  { %v253_v59 = vadd.f32 1e-05, %v252_v58 }
 0x32f   :  { %362 = vrsqrt.f32 %v253_v59  ;;  %vm260_vm5 = vweird.f32 %v253_v59 }
 0x335   :  { %v363_v60 = vpop.eup %362 }
 0x336   :  { %v255_v61 = vmul.f32 %v363_v60, %v253_v59  ;;  %vm261_vm4 = vweird.f32 %v363_v60 }
 0x337   :  { %vm262_vm6 = vmor %vm260_vm5, %vm261_vm4 }
 0x338   :  { %v256_v62 = vmul.f32 %v363_v60, %v255_v61 }
 0x33a   :  { %v257_v63 = vmul.f32 0.5, %v256_v62 }
 0x33c   :  { %v258_v0 = vsub.f32 1.5, %v257_v63 }
 0x33e   :  { %v259_v1 = vmul.f32 %v363_v60, %v258_v0 }
 0x340   :  { %v263_v3 = vsel %vm262_vm6, %v363_v60, %v259_v1 }
 0x341   :  { %v264_v5 = vmul.f32 %v263_v3, %v248_v55 }
 0x343   :  { %v266_v6 = vmul.f32 %v265_v2, %v264_v5 }
 0x345   :  { %v268_v7 = vadd.f32 %v267_v4, %v266_v6 }
 0x347   :  { %269 = vst [vmem:[%s475_s5] sm:$0xff] %v268_v7 }
 0x348   :  { %274 = vsyncpa [#allocation3], 1 }
 0x349   :  { %275 = vsyncpa [#allocation5], 1 }

</bundles_post_ra>
